<compile_context>
chip_gen: v7x
topology: tpu7x:2x2x1
jax: 0.10.0
libtpu: 0.0.40
codegen_flags: <defaults>
</compile_context>

<pallas_src>
import functools

import jax
import jax.numpy as jnp
from jax.experimental import pallas as pl
from jax.experimental.pallas import tpu as pltpu


def _mapping_kernel(x_ref, w_ref, b_ref, wh_ref, bh_ref, out_ref, *, depth):
    """One batch tile: normalize -> depth x (GEMM + LeakyReLU) -> fused head GEMM.

    Everything here is row-independent, so a partial last batch tile (garbage
    rows in the padded VMEM block) is safe: Pallas clamps the writeback and
    there is no cross-row reduction. Do not add batch-level statistics here
    without revisiting that assumption.
    """
    x = x_ref[...].astype(jnp.float32)

    # F.normalize(x, dim=-1): x / max(||x||_2, 1e-12) == x * rsqrt(max(ss, 1e-24))
    ss = jnp.sum(x * x, axis=-1, keepdims=True)
    h = x * jax.lax.rsqrt(jnp.maximum(ss, 1e-24))

    # MXU operand dtype follows the (pre-packed) weights; accumulation is f32.
    mxu_dtype = w_ref.dtype

    # Hidden stack (statically unrolled; `depth` is a trace-time constant).
    for i in range(depth):
        y = jnp.dot(h.astype(mxu_dtype), w_ref[i],
                    preferred_element_type=jnp.float32) + b_ref[i]
        h = jnp.maximum(y, 0.2 * y)  # LeakyReLU(negative_slope=0.2), slope < 1

    # Fused gamma/beta head: ONE GEMM into a lane-dense (block_m, out_pad) slab
    # (out_pad is a multiple of 128; pad columns are zero-weight/zero-bias).
    out = jnp.dot(h.astype(mxu_dtype), wh_ref[...],
                  preferred_element_type=jnp.float32) + bh_ref[...]
    out_ref[...] = out.astype(out_ref.dtype)


def init_mapping_params(key, dim_hidden, dim_out, depth=3):
    """Deterministic synthetic params, PyTorch nn.Linear shapes: W=(out,in), b=(out,)."""
    params = {}
    keys = jax.random.split(key, 2 * depth + 4)
    k_i = 0
    bound = 1.0 / jnp.sqrt(dim_hidden)
    for i in range(depth):
        params[f"w{i}"] = jax.random.uniform(
            keys[k_i], (dim_hidden, dim_hidden), jnp.float32, -bound, bound); k_i += 1
        params[f"b{i}"] = jax.random.uniform(
            keys[k_i], (dim_hidden,), jnp.float32, -bound, bound); k_i += 1
    params["wg"] = jax.random.uniform(keys[k_i], (dim_out, dim_hidden), jnp.float32, -bound, bound); k_i += 1
    params["bg"] = jax.random.uniform(keys[k_i], (dim_out,), jnp.float32, -bound, bound); k_i += 1
    params["wb"] = jax.random.uniform(keys[k_i], (dim_out, dim_hidden), jnp.float32, -bound, bound); k_i += 1
    params["bb"] = jax.random.uniform(keys[k_i], (dim_out,), jnp.float32, -bound, bound); k_i += 1
    return params


def prepare_params(params, depth=3, mxu_dtype=None, lane_pad=128):
    """ONE-TIME packing (outside the per-call dispatch path).

    Returns:
      w_stack: (depth, H, H)       hidden weights, pre-transposed to (in, out), mxu dtype
      b_stack: (depth, 1, H)       hidden biases as rows, f32 (added post-accumulation)
      w_head : (H, out_pad)        [gamma | beta | 0-pad] head weights, mxu dtype
      b_head : (1, out_pad)        [gamma | beta | 0-pad] head biases, f32

    out_pad = round_up(2*dim_out, 128) so the kernel's output slab is lane-dense.
    mxu_dtype defaults to bf16 for production hidden sizes (H >= 128: bf16-native
    MXU on v6e/v7x, halves weight VMEM/DMA) and f32 for small/benchmark sizes.
    """
    H = params["w0"].shape[0]
    dim_out = params["wg"].shape[0]
    if mxu_dtype is None:
        mxu_dtype = jnp.bfloat16 if H >= 128 else jnp.float32

    w_stack = jnp.stack([params[f"w{i}"].T for i in range(depth)]).astype(mxu_dtype)
    b_stack = jnp.stack([params[f"b{i}"].reshape(1, -1) for i in range(depth)]
                        ).astype(jnp.float32)

    two_out = 2 * dim_out
    out_pad = ((two_out + lane_pad - 1) // lane_pad) * lane_pad
    w_head = jnp.zeros((H, out_pad), mxu_dtype)
    w_head = w_head.at[:, :dim_out].set(params["wg"].T.astype(mxu_dtype))
    w_head = w_head.at[:, dim_out:two_out].set(params["wb"].T.astype(mxu_dtype))
    b_head = jnp.zeros((1, out_pad), jnp.float32)
    b_head = b_head.at[0, :dim_out].set(params["bg"].astype(jnp.float32))
    b_head = b_head.at[0, dim_out:two_out].set(params["bb"].astype(jnp.float32))
    return w_stack, b_stack, w_head, b_head


@functools.partial(jax.jit, static_argnames=("dim_out", "depth", "block_m"))
def mapping_network(x, w_stack, b_stack, w_head, b_head, *, dim_out, depth=3,
                    block_m=None):
    """x: (B, H) f32 -> (gamma, beta), each (B, dim_out) f32."""
    B, H = x.shape
    out_pad = w_head.shape[1]

    if block_m is None:
        if B <= 16:
            # Too few rows to split; one tile (block equals full batch dim, so
            # the (8,128) divisibility rule is satisfied even for odd B).
            block_m = B
        else:
            # >= 2 balanced multiple-of-8 tiles keep both v7x TensorCores busy
            # on the "parallel" batch axis; cap at 4096 rows (~(H+out_pad)*4 B
            # per row) which amortizes the ~0.35us/step grid overhead with no
            # VMEM risk even on v7x's 64 MiB.
            n_tiles = max(2, -(-B // 4096))
            block_m = min(B, ((-(-B // n_tiles) + 7) // 8) * 8)
    grid = (pl.cdiv(B, block_m),)

    # VMEM budget computed from the actual tiling (2x weights for the default
    # double buffer, 4x I/O tiles for in+out double buffers, + slack), clamped
    # to a sane range. Self-documents the footprint; avoids over-reserving the
    # scoped budget on v7x.
    weight_bytes = ((w_stack.size + w_head.size) * w_stack.dtype.itemsize
                    + (b_stack.size + b_head.size) * 4)
    io_bytes = block_m * (H + out_pad) * 4
    vmem_limit = int(min(96 * 2**20,
                         max(8 * 2**20, 2 * weight_bytes + 4 * io_bytes + 4 * 2**20)))

    vmem = pltpu.MemorySpace.VMEM

    out = pl.pallas_call(
        functools.partial(_mapping_kernel, depth=depth),
        out_shape=jax.ShapeDtypeStruct((B, out_pad), jnp.float32),
        grid_spec=pltpu.PrefetchScalarGridSpec(
            num_scalar_prefetch=0,
            grid=grid,
            in_specs=[
                # Activations: tiled over batch rows.
                pl.BlockSpec((block_m, H), lambda i: (i, 0), memory_space=vmem),
                # Weights/biases: full blocks pinned to block 0 -> VMEM-resident
                # across the whole batch grid (constant index_map => no re-DMA).
                pl.BlockSpec((depth, H, H), lambda i: (0, 0, 0), memory_space=vmem),
                pl.BlockSpec((depth, 1, H), lambda i: (0, 0, 0), memory_space=vmem),
                pl.BlockSpec((H, out_pad), lambda i: (0, 0), memory_space=vmem),
                pl.BlockSpec((1, out_pad), lambda i: (0, 0), memory_space=vmem),
            ],
            out_specs=pl.BlockSpec((block_m, out_pad), lambda i: (i, 0),
                                   memory_space=vmem),
        ),
        compiler_params=pltpu.CompilerParams(
            dimension_semantics=("parallel",),  # batch tiles split across TCs (v7x)
            vmem_limit_bytes=vmem_limit,
        ),
    )(x, w_stack, b_stack, w_head, b_head)

    # Free view-splits in the wrapper; kernel writes one lane-dense padded slab.
    return out[:, :dim_out], out[:, dim_out:2 * dim_out]


def _reference(x, params, depth=3):
    """Pure-JAX reference mirroring the PyTorch forward (original param layout)."""
    norm = jnp.sqrt(jnp.sum(x * x, axis=-1, keepdims=True))
    h = x / jnp.maximum(norm, 1e-12)
    for i in range(depth):
        h = h @ params[f"w{i}"].T + params[f"b{i}"]
        h = jnp.where(h > 0, h, 0.2 * h)
    gamma = h @ params["wg"].T + params["bg"]
    beta = h @ params["wb"].T + params["bb"]
    return gamma, beta


if __name__ == "__main__":
    B = 8
    DIM_HIDDEN = 32
    DIM_OUT = 16
    DEPTH = 3

    key = jax.random.PRNGKey(0)
    k_x, k_p = jax.random.split(key)
    x = jax.random.normal(k_x, (B, DIM_HIDDEN), jnp.float32)
    params = init_mapping_params(k_p, DIM_HIDDEN, DIM_OUT, depth=DEPTH)

    # One-time packing; NOT inside the per-call jit path.
    packed = prepare_params(params, depth=DEPTH)
    packed = jax.block_until_ready(packed)

    gamma, beta = mapping_network(x, *packed, dim_out=DIM_OUT, depth=DEPTH)
    jax.block_until_ready((gamma, beta))

    g_ref, b_ref = _reference(x, params, depth=DEPTH)
    assert gamma.shape == (B, DIM_OUT) and beta.shape == (B, DIM_OUT)
    assert jnp.allclose(gamma, g_ref, atol=1e-5, rtol=1e-5)
    assert jnp.allclose(beta, b_ref, atol=1e-5, rtol=1e-5)

    print("KERNEL_OK")
</pallas_src>

<mosaic_0001>
module attributes {stable_mosaic.version = 11 : i64} {
  func.func @_mapping_kernel(%arg0: i32, %arg1: memref<8x32xf32, #tpu.memory_space<vmem>>, %arg2: memref<3x32x32xf32, #tpu.memory_space<vmem>>, %arg3: memref<3x1x32xf32, #tpu.memory_space<vmem>>, %arg4: memref<32x128xf32, #tpu.memory_space<vmem>>, %arg5: memref<1x128xf32, #tpu.memory_space<vmem>>, %arg6: memref<8x128xf32, #tpu.memory_space<vmem>>) attributes {dimension_semantics = [#tpu.dimension_semantics<parallel>], iteration_bounds = array<i64: 1>, scalar_prefetch = 0 : i64, scratch_operands = 0 : i64, tpu.core_type = #tpu.core_type<tc>, window_params = [{transform_indices = @transform_0, window_bounds = array<i64: 8, 32>}, {pipeline_mode = #tpu.pipeline_mode<synchronous>, transform_indices = @transform_1, window_bounds = array<i64: 3, 32, 32>}, {pipeline_mode = #tpu.pipeline_mode<synchronous>, transform_indices = @transform_2, window_bounds = array<i64: 3, 1, 32>}, {pipeline_mode = #tpu.pipeline_mode<synchronous>, transform_indices = @transform_3, window_bounds = array<i64: 32, 128>}, {pipeline_mode = #tpu.pipeline_mode<synchronous>, transform_indices = @transform_4, window_bounds = array<i64: 1, 128>}, {transform_indices = @transform_5, window_bounds = array<i64: 8, 128>}]} {
    %c0 = arith.constant 0 : index
    %c0_0 = arith.constant 0 : index
    %0 = vector.load %arg1[%c0, %c0_0] : memref<8x32xf32, #tpu.memory_space<vmem>>, vector<8x32xf32>
    %1 = arith.mulf %0, %0 : vector<8x32xf32>
    %cst = arith.constant dense<0.000000e+00> : vector<8xf32>
    %2 = vector.multi_reduction <add>, %1, %cst [1] : vector<8x32xf32> to vector<8xf32>
    %3 = vector.shape_cast %2 : vector<8xf32> to vector<8x1xf32>
    %cst_1 = arith.constant 1.000000e-24 : f32
    %4 = vector.broadcast %cst_1 : f32 to vector<8x1xf32>
    %5 = arith.maximumf %3, %4 : vector<8x1xf32>
    %6 = math.rsqrt %5 : vector<8x1xf32>
    %7 = vector.broadcast %6 : vector<8x1xf32> to vector<8x32xf32>
    %8 = arith.mulf %0, %7 : vector<8x32xf32>
    %c0_2 = arith.constant 0 : index
    %c0_3 = arith.constant 0 : index
    %c0_4 = arith.constant 0 : index
    %9 = vector.load %arg2[%c0_2, %c0_3, %c0_4] : memref<3x32x32xf32, #tpu.memory_space<vmem>>, vector<1x32x32xf32>
    %10 = vector.shape_cast %9 : vector<1x32x32xf32> to vector<32x32xf32>
    %cst_5 = arith.constant dense<0.000000e+00> : vector<8x32xf32>
    %11 = tpu.matmul %8, %10, %cst_5 {dimension_numbers = #tpu.dot_dimension_numbers<[1], [0], [0], [1], [0, 0, 1, 1], [], []>} : vector<8x32xf32>, vector<32x32xf32>, vector<8x32xf32> -> vector<8x32xf32>
    %c0_6 = arith.constant 0 : index
    %c0_7 = arith.constant 0 : index
    %c0_8 = arith.constant 0 : index
    %12 = vector.load %arg3[%c0_6, %c0_7, %c0_8] : memref<3x1x32xf32, #tpu.memory_space<vmem>>, vector<1x1x32xf32>
    %13 = vector.shape_cast %12 : vector<1x1x32xf32> to vector<1x32xf32>
    %14 = vector.broadcast %13 : vector<1x32xf32> to vector<8x32xf32>
    %15 = arith.addf %11, %14 : vector<8x32xf32>
    %cst_9 = arith.constant 2.000000e-01 : f32
    %16 = vector.broadcast %cst_9 : f32 to vector<8x32xf32>
    %17 = arith.mulf %16, %15 : vector<8x32xf32>
    %18 = arith.maximumf %15, %17 : vector<8x32xf32>
    %c1 = arith.constant 1 : index
    %c0_10 = arith.constant 0 : index
    %c0_11 = arith.constant 0 : index
    %19 = vector.load %arg2[%c1, %c0_10, %c0_11] : memref<3x32x32xf32, #tpu.memory_space<vmem>>, vector<1x32x32xf32>
    %20 = vector.shape_cast %19 : vector<1x32x32xf32> to vector<32x32xf32>
    %cst_12 = arith.constant dense<0.000000e+00> : vector<8x32xf32>
    %21 = tpu.matmul %18, %20, %cst_12 {dimension_numbers = #tpu.dot_dimension_numbers<[1], [0], [0], [1], [0, 0, 1, 1], [], []>} : vector<8x32xf32>, vector<32x32xf32>, vector<8x32xf32> -> vector<8x32xf32>
    %c1_13 = arith.constant 1 : index
    %c0_14 = arith.constant 0 : index
    %c0_15 = arith.constant 0 : index
    %22 = vector.load %arg3[%c1_13, %c0_14, %c0_15] : memref<3x1x32xf32, #tpu.memory_space<vmem>>, vector<1x1x32xf32>
    %23 = vector.shape_cast %22 : vector<1x1x32xf32> to vector<1x32xf32>
    %24 = vector.broadcast %23 : vector<1x32xf32> to vector<8x32xf32>
    %25 = arith.addf %21, %24 : vector<8x32xf32>
    %cst_16 = arith.constant 2.000000e-01 : f32
    %26 = vector.broadcast %cst_16 : f32 to vector<8x32xf32>
    %27 = arith.mulf %26, %25 : vector<8x32xf32>
    %28 = arith.maximumf %25, %27 : vector<8x32xf32>
    %c2 = arith.constant 2 : index
    %c0_17 = arith.constant 0 : index
    %c0_18 = arith.constant 0 : index
    %29 = vector.load %arg2[%c2, %c0_17, %c0_18] : memref<3x32x32xf32, #tpu.memory_space<vmem>>, vector<1x32x32xf32>
    %30 = vector.shape_cast %29 : vector<1x32x32xf32> to vector<32x32xf32>
    %cst_19 = arith.constant dense<0.000000e+00> : vector<8x32xf32>
    %31 = tpu.matmul %28, %30, %cst_19 {dimension_numbers = #tpu.dot_dimension_numbers<[1], [0], [0], [1], [0, 0, 1, 1], [], []>} : vector<8x32xf32>, vector<32x32xf32>, vector<8x32xf32> -> vector<8x32xf32>
    %c2_20 = arith.constant 2 : index
    %c0_21 = arith.constant 0 : index
    %c0_22 = arith.constant 0 : index
    %32 = vector.load %arg3[%c2_20, %c0_21, %c0_22] : memref<3x1x32xf32, #tpu.memory_space<vmem>>, vector<1x1x32xf32>
    %33 = vector.shape_cast %32 : vector<1x1x32xf32> to vector<1x32xf32>
    %34 = vector.broadcast %33 : vector<1x32xf32> to vector<8x32xf32>
    %35 = arith.addf %31, %34 : vector<8x32xf32>
    %cst_23 = arith.constant 2.000000e-01 : f32
    %36 = vector.broadcast %cst_23 : f32 to vector<8x32xf32>
    %37 = arith.mulf %36, %35 : vector<8x32xf32>
    %38 = arith.maximumf %35, %37 : vector<8x32xf32>
    %c0_24 = arith.constant 0 : index
    %c0_25 = arith.constant 0 : index
    %39 = vector.load %arg4[%c0_24, %c0_25] : memref<32x128xf32, #tpu.memory_space<vmem>>, vector<32x128xf32>
    %cst_26 = arith.constant dense<0.000000e+00> : vector<8x128xf32>
    %40 = tpu.matmul %38, %39, %cst_26 {dimension_numbers = #tpu.dot_dimension_numbers<[1], [0], [0], [1], [0, 0, 1, 1], [], []>} : vector<8x32xf32>, vector<32x128xf32>, vector<8x128xf32> -> vector<8x128xf32>
    %c0_27 = arith.constant 0 : index
    %c0_28 = arith.constant 0 : index
    %41 = vector.load %arg5[%c0_27, %c0_28] : memref<1x128xf32, #tpu.memory_space<vmem>>, vector<1x128xf32>
    %42 = vector.broadcast %41 : vector<1x128xf32> to vector<8x128xf32>
    %43 = arith.addf %40, %42 : vector<8x128xf32>
    %c0_29 = arith.constant 0 : index
    %c0_30 = arith.constant 0 : index
    %44 = vector.load %arg6[%c0_29, %c0_30] : memref<8x128xf32, #tpu.memory_space<vmem>>, vector<8x128xf32>
    tpu.vector_store %arg6[%c0_29, %c0_30], %43 {strides = array<i32>} : memref<8x128xf32, #tpu.memory_space<vmem>>, vector<8x128xf32>,
    return
  }
  func.func @transform_0(%arg0: i32) -> (i32, i32) {
    %c0_i32 = arith.constant 0 : i32
    %c0_i32_0 = arith.constant 0 : i32
    return %arg0, %c0_i32 : i32, i32
  }
  func.func @transform_1(%arg0: i32) -> (i32, i32, i32) {
    %c0_i32 = arith.constant 0 : i32
    %c0_i32_0 = arith.constant 0 : i32
    %c0_i32_1 = arith.constant 0 : i32
    %c0_i32_2 = arith.constant 0 : i32
    return %c0_i32, %c0_i32_0, %c0_i32_1 : i32, i32, i32
  }
  func.func @transform_2(%arg0: i32) -> (i32, i32, i32) {
    %c0_i32 = arith.constant 0 : i32
    %c0_i32_0 = arith.constant 0 : i32
    %c0_i32_1 = arith.constant 0 : i32
    %c0_i32_2 = arith.constant 0 : i32
    return %c0_i32, %c0_i32_0, %c0_i32_1 : i32, i32, i32
  }
  func.func @transform_3(%arg0: i32) -> (i32, i32) {
    %c0_i32 = arith.constant 0 : i32
    %c0_i32_0 = arith.constant 0 : i32
    %c0_i32_1 = arith.constant 0 : i32
    return %c0_i32, %c0_i32_0 : i32, i32
  }
  func.func @transform_4(%arg0: i32) -> (i32, i32) {
    %c0_i32 = arith.constant 0 : i32
    %c0_i32_0 = arith.constant 0 : i32
    %c0_i32_1 = arith.constant 0 : i32
    return %c0_i32, %c0_i32_0 : i32, i32
  }
  func.func @transform_5(%arg0: i32) -> (i32, i32) {
    %c0_i32 = arith.constant 0 : i32
    %c0_i32_0 = arith.constant 0 : i32
    return %arg0, %c0_i32 : i32, i32
  }
}

</mosaic_0001>

<bundles_post_ra>
// kernel: mapping_network.1
= control target key start
LH: loop header
LB: loop body
LE: loop exit
PB: predicated region body
PF: predicated region fallthrough
CT: control target
= control target key end

     0   :  { %10 = vsyncpa [#allocation3], 0  ;;  %s703_s0 = inlined_call_operand.hbm [shape: f32[8,32], index: 0, kind: input, shape index: {}]   ;;  %s704_s1 = inlined_call_operand.hbm [shape: f32[3,32,32], index: 1, kind: input, shape index: {}]   ;;  %s705_s2 = inlined_call_operand.vmem [shape: f32[3,1,32], index: 2, kind: input, shape index: {}]   ;;  %s706_s3 = inlined_call_operand.hbm [shape: f32[32,128], index: 3, kind: input, shape index: {}]   ;;  %s707_s4 = inlined_call_operand.vmem [shape: f32[1,128], index: 4, kind: input, shape index: {}]   ;;  %s708_s5 = inlined_call_operand.vmem [shape: f32[8,128], index: 5, kind: output, shape index: {}]  }
   0x1   :  { %11 = vsyncpa [#allocation5], 0  ;;  %s599_s18 = smov [#allocation4]   ;;  %s529_s22 = scalar_lea.hbm %s704_s1, 1536 }
   0x2   :  { %s27_s19 = sshll.u32 %s599_s18, 4  ;;  %p530_p0 = scmp.ne.s32.totalorder %s704_s1, %s529_s22  ;;  %s28_s19 = int_to_ptr.vmem [resolvable:$true] %s27_s19 }
   0x3   :  { %p533_p1 = scmp.lt.u32.totalorder %s529_s22, %s704_s1 }
   0x5   :  { %p535_p2 = pnand %p533_p1, %p530_p0 }
   0x7   :  { %538 = shalt.err (!%p535_p2)
}
   0x8   :  { %s539_s27 = scalar_lea.vmem %s28_s19, 1536  ;;  %p544_p4 = scmp.lt.s32.totalorder %s28_s19, %s28_s19 }
   0x9   :  { %p540_p3 = scmp.ne.s32.totalorder %s28_s19, %s539_s27  ;;  %p545_p5 = scmp.lt.s32.totalorder %s539_s27, %s539_s27 }
   0xb   :  { %p546_p6 = por %p545_p5, %p544_p4 }
   0xd   :  { %p547_p7 = pnand %p546_p6, %p540_p3 }
   0xf   :  { %550 = shalt.err (!%p547_p7)
}
  0x10   :  { %s600_s28 = smov 128   ;;  %s601_s29 = smov 8  }
  0x11   :  { %33 = dma.hbm_to_vmem [thread:$0]  %s704_s1, 1536, %s28_s19, [#allocation5], %s600_s28, %s600_s28, %s601_s29  }
  0x12   :  { %s602_s7 = smov [#allocation2]   ;;  %s603_s9 = smov [#allocation6]  }
  0x13   :  { %s18_s8 = sshll.u32 %s602_s7, 4  ;;  %s41_s10 = sshll.u32 %s603_s9, 4  ;;  %s19_s8 = int_to_ptr.vmem [resolvable:$true] %s18_s8  ;;  %s42_s10 = int_to_ptr.vmem [resolvable:$true] %s41_s10 }
  0x14   :  { %s551_s13 = scalar_lea.hbm %s703_s0, 128 }
  0x15   :  { %p552_p8 = scmp.ne.s32.totalorder %s703_s0, %s551_s13  ;;  %p555_p9 = scmp.lt.u32.totalorder %s551_s13, %s703_s0 }
  0x17   :  { %p557_p10 = pnand %p555_p9, %p552_p8 }
  0x19   :  { %560 = shalt.err (!%p557_p10)
}
  0x1a   :  { %s561_s1 = scalar_lea.vmem %s19_s8, 128  ;;  %p566_p12 = scmp.lt.s32.totalorder %s19_s8, %s19_s8 }
  0x1b   :  { %p562_p11 = scmp.ne.s32.totalorder %s19_s8, %s561_s1  ;;  %p567_p13 = scmp.lt.s32.totalorder %s561_s1, %s561_s1 }
  0x1d   :  { %p568_p0 = por %p567_p13, %p566_p12 }
  0x1f   :  { %p569_p1 = pnand %p568_p0, %p562_p11 }
  0x21   :  { %572 = shalt.err (!%p569_p1)
}
  0x22   :  { %21 = dma.hbm_to_vmem [thread:$0]  %s703_s0, 128, %s19_s8, [#allocation3]  }
  0x23   :  { %s573_s22 = scalar_lea.hbm %s706_s3, 512 }
  0x24   :  { %p574_p2 = scmp.ne.s32.totalorder %s706_s3, %s573_s22  ;;  %p577_p3 = scmp.lt.u32.totalorder %s573_s22, %s706_s3 }
  0x26   :  { %p579_p4 = pnand %p577_p3, %p574_p2 }
  0x28   :  { %582 = shalt.err (!%p579_p4)
}
  0x29   :  { %s583_s27 = scalar_lea.vmem %s42_s10, 512  ;;  %p588_p6 = scmp.lt.s32.totalorder %s42_s10, %s42_s10 }
  0x2a   :  { %p584_p5 = scmp.ne.s32.totalorder %s42_s10, %s583_s27  ;;  %p589_p7 = scmp.lt.s32.totalorder %s583_s27, %s583_s27 }
  0x2c   :  { %p590_p8 = por %p589_p7, %p588_p6 }
  0x2e   :  { %p591_p9 = pnand %p590_p8, %p584_p5 }
  0x30   :  { %594 = shalt.err (!%p591_p9)
}
  0x31   :  { %47 = dma.hbm_to_vmem [thread:$0]  %s706_s3, 512, %s42_s10, [#allocation5], %s600_s28, %s600_s28, %s601_s29  }
  0x32   :  { %595 = dma.done.wait [#allocation3], 128  }
  0x33   :  { %596 = vsyncadd [#allocation3], 4294967168 }
  0x34   :  { %597 = dma.done.wait [#allocation5], 2048  }
  0x35   :  { %598 = vsyncadd [#allocation5], 4294965248  ;;  %v59_v0 = vld [vmem:[#allocation2] sm:$0xff]  ;;  %vm61_vm0 = vcmask 261120   ;;  %v68_v3 = vld [vmem:[#allocation4] sm:$0xff]  ;;  %v604_v6 = vmov 0.0|0.0  }
  0x36   :  { %v60_v1 = vmul.f32 %v59_v0, %v59_v0  ;;  %v69_v4 = vld [vmem:[#allocation4 + $0x8] sm:$0xff]  ;;  %v70_v5 = vld [vmem:[#allocation4 + $0x10] sm:$0xff]  ;;  %495 = vmatprep.subr.bf16.mxu0 %v604_v6  ;;  %v71_v8 = vld [vmem:[#allocation4 + $0x18] sm:$0xff]  ;;  %vm605_vm1 = vmmov 0   ;;  %v606_v9 = vmov 0.0   ;;  %501 = vmatprep.subr.bf16.mxu1 %v604_v6 }
  0x37   :  { %v496_v7 = vpack.c.bf16 %v69_v4, %v68_v3  ;;  %459 = vmatprep.mubr.msk.f32.mxu0 %vm605_vm1, %v606_v9  ;;  %470 = vmatprep.mubr.msk.f32.mxu1 %vm605_vm1, %v606_v9  ;;  %v499_v10 = vpack.c.bf16 %v71_v8, %v70_v5  ;;  %v155_v15 = vld [vmem:[#allocation4 + $0x20] sm:$0xff]  ;;  %v156_v16 = vld [vmem:[#allocation4 + $0x28] sm:$0xff]  ;;  %v157_v18 = vld [vmem:[#allocation4 + $0x30] sm:$0xff] }
  0x38   :  { %v62_v2 = vsel %vm61_vm0, %v60_v1, 0.0  ;;  %v502_v17 = vpack.c.bf16 %v156_v16, %v155_v15  ;;  %v158_v19 = vld [vmem:[#allocation4 + $0x38] sm:$0xff]  ;;  %v243_v27 = vld [vmem:[#allocation4 + $0x40] sm:$0xff]  ;;  %v244_v28 = vld [vmem:[#allocation4 + $0x48] sm:$0xff] }
  0x39   :  { %63 = vadd.xlane.f32.xlu0 %v62_v2  ;;  %497 = vmatpush3.bf16.msra.mxu0 %v496_v7  ;;  %v505_v20 = vpack.c.bf16 %v158_v19, %v157_v18  ;;  %v421_v21 = vld [vmem:[%s705_s2] ss:$0 sm:$0xff]  ;;  %v508_v29 = vpack.c.bf16 %v244_v28, %v243_v27  ;;  %v245_v30 = vld [vmem:[#allocation4 + $0x50] sm:$0xff]  ;;  %v424_v33 = vld [vmem:[%s705_s2 + $0x1] ss:$0 sm:$0xff] }
  0x3a   :  { %498 = vmatprep.subr.bf16.mxu0 %v604_v6  ;;  %503 = vmatpush3.bf16.msra.mxu1 %v502_v17  ;;  %v246_v31 = vld [vmem:[#allocation4 + $0x58] sm:$0xff]  ;;  %v330_v39 = vld [vmem:[#allocation6] sm:$0xff]  ;;  %v331_v40 = vld [vmem:[#allocation6 + $0x8] sm:$0xff] }
  0x3b   :  { %504 = vmatprep.subr.bf16.mxu1 %v604_v6  ;;  %v511_v32 = vpack.c.bf16 %v246_v31, %v245_v30  ;;  %v514_v41 = vpack.c.bf16 %v331_v40, %v330_v39  ;;  %v332_v42 = vld [vmem:[#allocation6 + $0x10] sm:$0xff]  ;;  %v333_v43 = vld [vmem:[#allocation6 + $0x18] sm:$0xff] }
  0x3c   :  { %v517_v44 = vpack.c.bf16 %v333_v43, %v332_v42  ;;  %v427_v45 = vld [vmem:[%s705_s2 + $0x2] ss:$0 sm:$0xff]  ;;  %v429_v51 = vld [vmem:[%s707_s4] ss:$0 sm:$0xff] }
  0x3d   :  { %500 = vmatpush3.bf16.msra.mxu0 %v499_v10 }
  0x3e   :  { %507 = vmatprep.subr.bf16.mxu0 %v604_v6  ;;  %506 = vmatpush3.bf16.msra.mxu1 %v505_v20 }
  0x3f   :  { %513 = vmatprep.subr.bf16.mxu1 %v604_v6 }
  0xc6   :  { %v64_v11 = vpop.xlane.xlu0 %63 }
  0xc7   :  { %v65_v12 = vmax.f32 %v64_v11, 1e-24 }
  0xc9   :  { %527 = vrsqrt.f32 %v65_v12 }
  0xd3   :  { %v528_v13 = vpop.eup %527 }
  0xd4   :  { %v67_v14 = vmul.f32 %v528_v13, %v59_v0 }
  0xd6   :  { %460 = vmatmul.mubr.msk.f32.vlgmr.msra.gmra.mrb[0].mxu0 %vm61_vm0, %v67_v14 }
  0xd7   :  { %481 = vmatprep.mubr.msk.f32.mxu0 %vm605_vm1, %v606_v9  ;;  %509 = vmatpush3.bf16.msra.mxu0 %v508_v29 }
  0xd8   :  { %510 = vmatprep.subr.bf16.mxu0 %v604_v6 }
  0xdb   :  { %512 = vmatpush3.bf16.msra.mxu0 %v511_v32 }
 0x1a9   :  { %v148_v22 = vpop.f32.mrb[0].mxu0 }
 0x1aa   :  { %v149_v23 = vadd.f32 %v421_v21, %v148_v22  ;;  %v461_v24 = vpop.f32.mrb[1].mxu0 }
 0x1ac   :  { %v152_v25 = vmul.f32 0.2, %v149_v23 }
 0x1ae   :  { %v153_v26 = vmax.f32 %v149_v23, %v152_v25 }
 0x1b0   :  { %471 = vmatmul.mubr.msk.f32.vlgmr.msra.gmra.mrb[0].mxu1 %vm61_vm0, %v153_v26 }
 0x1b1   :  { %492 = vmatprep.mubr.msk.f32.mxu1 %vm605_vm1, %v606_v9  ;;  %515 = vmatpush3.bf16.msra.mxu1 %v514_v41 }
 0x1b2   :  { %516 = vmatprep.subr.bf16.mxu1 %v604_v6 }
 0x1b5   :  { %518 = vmatpush3.bf16.msra.mxu1 %v517_v44 }
 0x283   :  { %v236_v34 = vpop.f32.mrb[0].mxu1 }
 0x284   :  { %v237_v35 = vadd.f32 %v424_v33, %v236_v34  ;;  %v472_v36 = vpop.f32.mrb[1].mxu1 }
 0x286   :  { %v240_v37 = vmul.f32 0.2, %v237_v35 }
 0x288   :  { %v241_v38 = vmax.f32 %v237_v35, %v240_v37 }
 0x28a   :  { %482 = vmatmul.mubr.msk.f32.vlgmr.msra.gmra.mrb[2].mxu0 %vm61_vm0, %v241_v38 }
 0x35d   :  { %v324_v46 = vpop.f32.mrb[2].mxu0 }
 0x35e   :  { %v325_v47 = vadd.f32 %v427_v45, %v324_v46  ;;  %v483_v48 = vpop.f32.mrb[3].mxu0 }
 0x360   :  { %v328_v49 = vmul.f32 0.2, %v325_v47 }
 0x362   :  { %v329_v50 = vmax.f32 %v325_v47, %v328_v49 }
 0x364   :  { %493 = vmatmul.mubr.msk.f32.vlgmr.msra.gmra.mrb[2].mxu1 %vm61_vm0, %v329_v50 }
 0x437   :  { %v410_v52 = vpop.f32.mrb[2].mxu1 }
 0x438   :  { %v411_v53 = vadd.f32 %v429_v51, %v410_v52  ;;  %v494_v54 = vpop.f32.mrb[3].mxu1 }
 0x43a   :  { %414 = vst [vmem:[%s708_s5] sm:$0xff] %v411_v53 }
 0x43b   :  { %419 = vsyncpa [#allocation3], 1 }
 0x43c   :  { %420 = vsyncpa [#allocation5], 1 }

</bundles_post_ra>
